<compile_context>
chip_gen: v7x
topology: tpu7x:2x2x1
jax: 0.10.0
libtpu: 0.0.40
codegen_flags: <defaults>
</compile_context>

<pallas_src>
import jax
import jax.numpy as jnp
from jax.experimental import pallas as pl
from jax.experimental.pallas import tpu as pltpu


def _round_up(x, m):
    return (x + m - 1) // m * m


# -----------------------------------------------------------------------------
# Kernel 1: sequential recurrence over time chunks.
#   xp_ref:   (Tc, TB, Hp)  precomputed x_t @ W_ih + (b_ih + b_hh), zero-padded
#   whh_ref:  (Hp, Hp)      recurrent weight (already transposed: h @ W_hh)
#   h_out:    (Tc, TB, Hp)  hidden states for this chunk
#   h_carry:  (TB, Hp)      VMEM scratch carrying h across time chunks
# grid = (batch_shards ['parallel'], time_chunks ['arbitrary'])
# -----------------------------------------------------------------------------
def _make_recurrence_kernel(time_chunk):
    def kernel(xp_ref, whh_ref, h_out_ref, h_carry):
        # h_0 = 0 (PyTorch nn.RNN default); reset at the first time chunk of
        # each batch shard.
        @pl.when(pl.program_id(1) == 0)
        def _():
            h_carry[...] = jnp.zeros_like(h_carry)

        w_hh = whh_ref[...]  # resident weight tile, loaded once per grid step

        def step(i, h_prev):
            pre = xp_ref[i] + jnp.dot(h_prev, w_hh,
                                      preferred_element_type=jnp.float32)
            h = jnp.tanh(pre)
            h_out_ref[i] = h.astype(h_out_ref.dtype)
            return h

        h_carry[...] = jax.lax.fori_loop(0, time_chunk, step, h_carry[...],
                                         unroll=True)

    return kernel


# -----------------------------------------------------------------------------
# Kernel 2: output projection, hoisted off the serial path (parallel grid).
#   Y = H_all @ W_out + b_out  over all (time * batch) rows, lane-dense output.
# -----------------------------------------------------------------------------
def _out_proj_kernel(h_ref, w_ref, b_ref, y_ref):
    y_ref[...] = (jnp.dot(h_ref[...], w_ref[...],
                          preferred_element_type=jnp.float32)
                  + b_ref[...]).astype(y_ref.dtype)


def elman_forward(tokens, params, *, time_chunk=8):
    """tokens: (B, T) int32.  Returns (B, T, O) float32, matching MyElmanNetwork.forward."""
    emb_table = params["embedding"]                  # (vocab, E)
    w_ih = params["w_ih"]                            # (E, H)  (= weight_ih_l0.T)
    w_hh = params["w_hh"]                            # (H, H)  (= weight_hh_l0.T)
    bias = params["b_ih"] + params["b_hh"]           # (1, H)  folded RNN biases
    w_out = params["w_out"]                          # (H, O)  (= output_layer.weight.T)
    b_out = params["b_out"]                          # (1, O)

    B, T = tokens.shape
    E = emb_table.shape[1]
    H = w_hh.shape[0]
    O = w_out.shape[1]

    # Padded / aligned sizes.
    Bp = _round_up(B, 8)                              # sublane-aligned batch
    Hp = _round_up(H, 128)                            # lane-aligned hidden
    Op = _round_up(O, 128)                            # lane-dense output stores
    Tc = max(1, min(time_chunk, T))                   # timesteps per grid step
    T_pad = _round_up(T, Tc)

    f32 = jnp.float32
    w_hh_p = jnp.zeros((Hp, Hp), f32).at[:H, :H].set(w_hh.astype(f32))
    w_ih_p = jnp.zeros((E, Hp), f32).at[:, :H].set(w_ih.astype(f32))
    bias_p = jnp.zeros((1, Hp), f32).at[:, :H].set(bias.astype(f32))
    w_out_p = jnp.zeros((Hp, Op), f32).at[:H, :O].set(w_out.astype(f32))
    b_out_p = jnp.zeros((1, Op), f32).at[:, :O].set(b_out.astype(f32))

    # Embedding gather directly in time-major layout (no extra transpose pass),
    # then the hoisted input projection as ONE big matmul with folded biases.
    x_tm = emb_table[tokens.T].astype(f32)            # (T, B, E)
    x_proj = (jnp.dot(x_tm.reshape(T * B, E), w_ih_p,
                      preferred_element_type=jnp.float32)
              + bias_p).reshape(T, B, Hp)             # (T, B, Hp)
    x_proj = jnp.pad(x_proj, ((0, T_pad - T), (0, Bp - B), (0, 0)))  # (T_pad, Bp, Hp)

    # Batch shard size for the 'parallel' grid axis (megacore on v7x).
    if Bp <= 128:
        TB = Bp
    elif Bp % 128 == 0:
        TB = 128
    else:
        TB = Bp
    n_b = Bp // TB
    n_t = T_pad // Tc

    # ---- sequential recurrence kernel ---------------------------------------
    h_all = pl.pallas_call(
        _make_recurrence_kernel(Tc),
        out_shape=jax.ShapeDtypeStruct((T_pad, Bp, Hp), jnp.float32),
        grid_spec=pltpu.PrefetchScalarGridSpec(
            num_scalar_prefetch=0,
            grid=(n_b, n_t),
            in_specs=[
                pl.BlockSpec((Tc, TB, Hp), lambda b, t: (t, b, 0)),   # x_proj chunk
                pl.BlockSpec((Hp, Hp), lambda b, t: (0, 0)),          # W_hh (resident)
            ],
            out_specs=pl.BlockSpec((Tc, TB, Hp), lambda b, t: (t, b, 0)),
            scratch_shapes=[pltpu.VMEM((TB, Hp), jnp.float32)],        # carried h
        ),
        compiler_params=pltpu.CompilerParams(
            dimension_semantics=("parallel", "arbitrary")),
    )(x_proj, w_hh_p)

    # ---- output projection kernel (parallel over row tiles) -----------------
    R = T_pad * Bp
    Rt = Tc * Bp                                       # rows per grid step (divides R)
    h_flat = h_all.reshape(R, Hp)

    y_flat = pl.pallas_call(
        _out_proj_kernel,
        out_shape=jax.ShapeDtypeStruct((R, Op), jnp.float32),
        grid_spec=pltpu.PrefetchScalarGridSpec(
            num_scalar_prefetch=0,
            grid=(R // Rt,),
            in_specs=[
                pl.BlockSpec((Rt, Hp), lambda r: (r, 0)),   # hidden rows
                pl.BlockSpec((Hp, Op), lambda r: (0, 0)),   # W_out
                pl.BlockSpec((1, Op), lambda r: (0, 0)),    # b_out
            ],
            out_specs=pl.BlockSpec((Rt, Op), lambda r: (r, 0)),
        ),
        compiler_params=pltpu.CompilerParams(
            dimension_semantics=("parallel",)),
    )(h_flat, w_out_p, b_out_p)

    # Un-pad and return batch-first (B, T, O), matching PyTorch semantics.
    y = y_flat.reshape(T_pad, Bp, Op)[:T, :B, :O]
    return jnp.transpose(y, (1, 0, 2))


def elman_reference(tokens, params):
    """Pure-JAX reference (same math as the PyTorch module), for verification."""
    emb = params["embedding"][tokens]                  # (B, T, E)
    w_ih, w_hh = params["w_ih"], params["w_hh"]
    b = params["b_ih"] + params["b_hh"]                # (1, H)
    Bsz = tokens.shape[0]
    H = w_hh.shape[0]

    def step(h, x_t):
        h = jnp.tanh(x_t @ w_ih + h @ w_hh + b)
        return h, h

    h0 = jnp.zeros((Bsz, H), jnp.float32)
    _, hs = jax.lax.scan(step, h0, jnp.transpose(emb, (1, 0, 2)))
    hs = jnp.transpose(hs, (1, 0, 2))                  # (B, T, H)
    return hs @ params["w_out"] + params["b_out"]


def init_params(key, vocab_size, embedding_dim, hidden_size, output_size):
    ks = jax.random.split(key, 7)
    s_rnn = 1.0 / jnp.sqrt(hidden_size)
    s_out = 1.0 / jnp.sqrt(hidden_size)
    u = lambda k, shape, s: jax.random.uniform(k, shape, jnp.float32, -s, s)
    return {
        "embedding": jax.random.normal(ks[0], (vocab_size, embedding_dim), jnp.float32),
        "w_ih": u(ks[1], (embedding_dim, hidden_size), s_rnn),
        "w_hh": u(ks[2], (hidden_size, hidden_size), s_rnn),
        "b_ih": u(ks[3], (1, hidden_size), s_rnn),
        "b_hh": u(ks[4], (1, hidden_size), s_rnn),
        "w_out": u(ks[5], (hidden_size, output_size), s_out),
        "b_out": u(ks[6], (1, output_size), s_out),
    }


if __name__ == "__main__":
    # Small shapes consistent with the module's forward.
    B, T = 2, 8
    vocab_size, embedding_dim, hidden_size, output_size = 20, 16, 32, 8

    key = jax.random.PRNGKey(0)
    pkey, tkey = jax.random.split(key)
    params = init_params(pkey, vocab_size, embedding_dim, hidden_size, output_size)
    tokens = jax.random.randint(tkey, (B, T), 0, vocab_size, dtype=jnp.int32)

    out = jax.jit(elman_forward)(tokens, params)
    out = jax.block_until_ready(out)
    assert out.shape == (B, T, output_size)

    # Verify against the pure-JAX reference before declaring success.
    ref = elman_reference(tokens, params)
    max_err = float(jnp.max(jnp.abs(out - ref)))
    assert max_err < 1e-2, f"mismatch vs reference: max_err={max_err}"

    print("KERNEL_OK")
</pallas_src>

<mosaic_0001>
module attributes {stable_mosaic.version = 11 : i64} {
  func.func @kernel(%arg0: i32, %arg1: i32, %arg2: memref<8x8x128xf32, #tpu.memory_space<vmem>>, %arg3: memref<128x128xf32, #tpu.memory_space<vmem>>, %arg4: memref<8x8x128xf32, #tpu.memory_space<vmem>>, %arg5: memref<8x128xf32, #tpu.memory_space<vmem>>) attributes {dimension_semantics = [#tpu.dimension_semantics<parallel>, #tpu.dimension_semantics<arbitrary>], iteration_bounds = array<i64: 1, 1>, scalar_prefetch = 0 : i64, scratch_operands = 1 : i64, tpu.core_type = #tpu.core_type<tc>, window_params = [{transform_indices = @transform_0, window_bounds = array<i64: 8, 8, 128>}, {pipeline_mode = #tpu.pipeline_mode<synchronous>, transform_indices = @transform_1, window_bounds = array<i64: 128, 128>}, {transform_indices = @transform_2, window_bounds = array<i64: 8, 8, 128>}]} {
    %c0_i32 = arith.constant 0 : i32
    %0 = arith.cmpi eq, %arg1, %c0_i32 : i32
    %1 = arith.extui %0 : i1 to i32
    %c0_i32_0 = arith.constant 0 : i32
    %2 = arith.cmpi ne, %1, %c0_i32_0 : i32
    scf.if %2 {
      %cst_46 = arith.constant 0.000000e+00 : f32
      %86 = vector.broadcast %cst_46 : f32 to vector<8x128xf32>
      %c0_47 = arith.constant 0 : index
      %c0_48 = arith.constant 0 : index
      %87 = vector.load %arg5[%c0_47, %c0_48] : memref<8x128xf32, #tpu.memory_space<vmem>>, vector<8x128xf32>
      tpu.vector_store %arg5[%c0_47, %c0_48], %86 {strides = array<i32>} : memref<8x128xf32, #tpu.memory_space<vmem>>, vector<8x128xf32>,
    } else {
    }
    %c0 = arith.constant 0 : index
    %c0_1 = arith.constant 0 : index
    %3 = vector.load %arg3[%c0, %c0_1] : memref<128x128xf32, #tpu.memory_space<vmem>>, vector<128x128xf32>
    %c0_2 = arith.constant 0 : index
    %c0_3 = arith.constant 0 : index
    %4 = vector.load %arg5[%c0_2, %c0_3] : memref<8x128xf32, #tpu.memory_space<vmem>>, vector<8x128xf32>
    %c0_i32_4 = arith.constant 0 : i32
    %5 = arith.index_cast %c0_i32_4 : i32 to index
    %c0_5 = arith.constant 0 : index
    %c0_6 = arith.constant 0 : index
    %6 = vector.load %arg2[%5, %c0_5, %c0_6] : memref<8x8x128xf32, #tpu.memory_space<vmem>>, vector<1x8x128xf32>
    %7 = vector.shape_cast %6 : vector<1x8x128xf32> to vector<8x128xf32>
    %cst = arith.constant dense<0.000000e+00> : vector<8x128xf32>
    %8 = tpu.matmul %4, %3, %cst {dimension_numbers = #tpu.dot_dimension_numbers<[1], [0], [0], [1], [0, 0, 1, 1], [], []>} : vector<8x128xf32>, vector<128x128xf32>, vector<8x128xf32> -> vector<8x128xf32>
    %9 = arith.addf %7, %8 : vector<8x128xf32>
    %10 = math.tanh %9 : vector<8x128xf32>
    %11 = arith.index_cast %c0_i32_4 : i32 to index
    %c0_7 = arith.constant 0 : index
    %c0_8 = arith.constant 0 : index
    %12 = vector.load %arg4[%11, %c0_7, %c0_8] : memref<8x8x128xf32, #tpu.memory_space<vmem>>, vector<1x8x128xf32>
    %13 = vector.shape_cast %12 : vector<1x8x128xf32> to vector<8x128xf32>
    %14 = vector.shape_cast %10 : vector<8x128xf32> to vector<1x8x128xf32>
    tpu.vector_store %arg4[%11, %c0_7, %c0_8], %14 {strides = array<i32>} : memref<8x8x128xf32, #tpu.memory_space<vmem>>, vector<1x8x128xf32>,
    %c1_i32 = arith.constant 1 : i32
    %15 = arith.index_cast %c1_i32 : i32 to index
    %c0_9 = arith.constant 0 : index
    %c0_10 = arith.constant 0 : index
    %16 = vector.load %arg2[%15, %c0_9, %c0_10] : memref<8x8x128xf32, #tpu.memory_space<vmem>>, vector<1x8x128xf32>
    %17 = vector.shape_cast %16 : vector<1x8x128xf32> to vector<8x128xf32>
    %cst_11 = arith.constant dense<0.000000e+00> : vector<8x128xf32>
    %18 = tpu.matmul %10, %3, %cst_11 {dimension_numbers = #tpu.dot_dimension_numbers<[1], [0], [0], [1], [0, 0, 1, 1], [], []>} : vector<8x128xf32>, vector<128x128xf32>, vector<8x128xf32> -> vector<8x128xf32>
    %19 = arith.addf %17, %18 : vector<8x128xf32>
    %20 = math.tanh %19 : vector<8x128xf32>
    %21 = arith.index_cast %c1_i32 : i32 to index
    %c0_12 = arith.constant 0 : index
    %c0_13 = arith.constant 0 : index
    %22 = vector.load %arg4[%21, %c0_12, %c0_13] : memref<8x8x128xf32, #tpu.memory_space<vmem>>, vector<1x8x128xf32>
    %23 = vector.shape_cast %22 : vector<1x8x128xf32> to vector<8x128xf32>
    %24 = vector.shape_cast %20 : vector<8x128xf32> to vector<1x8x128xf32>
    tpu.vector_store %arg4[%21, %c0_12, %c0_13], %24 {strides = array<i32>} : memref<8x8x128xf32, #tpu.memory_space<vmem>>, vector<1x8x128xf32>,
    %c2_i32 = arith.constant 2 : i32
    %25 = arith.index_cast %c2_i32 : i32 to index
    %c0_14 = arith.constant 0 : index
    %c0_15 = arith.constant 0 : index
    %26 = vector.load %arg2[%25, %c0_14, %c0_15] : memref<8x8x128xf32, #tpu.memory_space<vmem>>, vector<1x8x128xf32>
    %27 = vector.shape_cast %26 : vector<1x8x128xf32> to vector<8x128xf32>
    %cst_16 = arith.constant dense<0.000000e+00> : vector<8x128xf32>
    %28 = tpu.matmul %20, %3, %cst_16 {dimension_numbers = #tpu.dot_dimension_numbers<[1], [0], [0], [1], [0, 0, 1, 1], [], []>} : vector<8x128xf32>, vector<128x128xf32>, vector<8x128xf32> -> vector<8x128xf32>
    %29 = arith.addf %27, %28 : vector<8x128xf32>
    %30 = math.tanh %29 : vector<8x128xf32>
    %31 = arith.index_cast %c2_i32 : i32 to index
    %c0_17 = arith.constant 0 : index
    %c0_18 = arith.constant 0 : index
    %32 = vector.load %arg4[%31, %c0_17, %c0_18] : memref<8x8x128xf32, #tpu.memory_space<vmem>>, vector<1x8x128xf32>
    %33 = vector.shape_cast %32 : vector<1x8x128xf32> to vector<8x128xf32>
    %34 = vector.shape_cast %30 : vector<8x128xf32> to vector<1x8x128xf32>
    tpu.vector_store %arg4[%31, %c0_17, %c0_18], %34 {strides = array<i32>} : memref<8x8x128xf32, #tpu.memory_space<vmem>>, vector<1x8x128xf32>,
    %c3_i32 = arith.constant 3 : i32
    %35 = arith.index_cast %c3_i32 : i32 to index
    %c0_19 = arith.constant 0 : index
    %c0_20 = arith.constant 0 : index
    %36 = vector.load %arg2[%35, %c0_19, %c0_20] : memref<8x8x128xf32, #tpu.memory_space<vmem>>, vector<1x8x128xf32>
    %37 = vector.shape_cast %36 : vector<1x8x128xf32> to vector<8x128xf32>
    %cst_21 = arith.constant dense<0.000000e+00> : vector<8x128xf32>
    %38 = tpu.matmul %30, %3, %cst_21 {dimension_numbers = #tpu.dot_dimension_numbers<[1], [0], [0], [1], [0, 0, 1, 1], [], []>} : vector<8x128xf32>, vector<128x128xf32>, vector<8x128xf32> -> vector<8x128xf32>
    %39 = arith.addf %37, %38 : vector<8x128xf32>
    %40 = math.tanh %39 : vector<8x128xf32>
    %41 = arith.index_cast %c3_i32 : i32 to index
    %c0_22 = arith.constant 0 : index
    %c0_23 = arith.constant 0 : index
    %42 = vector.load %arg4[%41, %c0_22, %c0_23] : memref<8x8x128xf32, #tpu.memory_space<vmem>>, vector<1x8x128xf32>
    %43 = vector.shape_cast %42 : vector<1x8x128xf32> to vector<8x128xf32>
    %44 = vector.shape_cast %40 : vector<8x128xf32> to vector<1x8x128xf32>
    tpu.vector_store %arg4[%41, %c0_22, %c0_23], %44 {strides = array<i32>} : memref<8x8x128xf32, #tpu.memory_space<vmem>>, vector<1x8x128xf32>,
    %c4_i32 = arith.constant 4 : i32
    %45 = arith.index_cast %c4_i32 : i32 to index
    %c0_24 = arith.constant 0 : index
    %c0_25 = arith.constant 0 : index
    %46 = vector.load %arg2[%45, %c0_24, %c0_25] : memref<8x8x128xf32, #tpu.memory_space<vmem>>, vector<1x8x128xf32>
    %47 = vector.shape_cast %46 : vector<1x8x128xf32> to vector<8x128xf32>
    %cst_26 = arith.constant dense<0.000000e+00> : vector<8x128xf32>
    %48 = tpu.matmul %40, %3, %cst_26 {dimension_numbers = #tpu.dot_dimension_numbers<[1], [0], [0], [1], [0, 0, 1, 1], [], []>} : vector<8x128xf32>, vector<128x128xf32>, vector<8x128xf32> -> vector<8x128xf32>
    %49 = arith.addf %47, %48 : vector<8x128xf32>
    %50 = math.tanh %49 : vector<8x128xf32>
    %51 = arith.index_cast %c4_i32 : i32 to index
    %c0_27 = arith.constant 0 : index
    %c0_28 = arith.constant 0 : index
    %52 = vector.load %arg4[%51, %c0_27, %c0_28] : memref<8x8x128xf32, #tpu.memory_space<vmem>>, vector<1x8x128xf32>
    %53 = vector.shape_cast %52 : vector<1x8x128xf32> to vector<8x128xf32>
    %54 = vector.shape_cast %50 : vector<8x128xf32> to vector<1x8x128xf32>
    tpu.vector_store %arg4[%51, %c0_27, %c0_28], %54 {strides = array<i32>} : memref<8x8x128xf32, #tpu.memory_space<vmem>>, vector<1x8x128xf32>,
    %c5_i32 = arith.constant 5 : i32
    %55 = arith.index_cast %c5_i32 : i32 to index
    %c0_29 = arith.constant 0 : index
    %c0_30 = arith.constant 0 : index
    %56 = vector.load %arg2[%55, %c0_29, %c0_30] : memref<8x8x128xf32, #tpu.memory_space<vmem>>, vector<1x8x128xf32>
    %57 = vector.shape_cast %56 : vector<1x8x128xf32> to vector<8x128xf32>
    %cst_31 = arith.constant dense<0.000000e+00> : vector<8x128xf32>
    %58 = tpu.matmul %50, %3, %cst_31 {dimension_numbers = #tpu.dot_dimension_numbers<[1], [0], [0], [1], [0, 0, 1, 1], [], []>} : vector<8x128xf32>, vector<128x128xf32>, vector<8x128xf32> -> vector<8x128xf32>
    %59 = arith.addf %57, %58 : vector<8x128xf32>
    %60 = math.tanh %59 : vector<8x128xf32>
    %61 = arith.index_cast %c5_i32 : i32 to index
    %c0_32 = arith.constant 0 : index
    %c0_33 = arith.constant 0 : index
    %62 = vector.load %arg4[%61, %c0_32, %c0_33] : memref<8x8x128xf32, #tpu.memory_space<vmem>>, vector<1x8x128xf32>
    %63 = vector.shape_cast %62 : vector<1x8x128xf32> to vector<8x128xf32>
    %64 = vector.shape_cast %60 : vector<8x128xf32> to vector<1x8x128xf32>
    tpu.vector_store %arg4[%61, %c0_32, %c0_33], %64 {strides = array<i32>} : memref<8x8x128xf32, #tpu.memory_space<vmem>>, vector<1x8x128xf32>,
    %c6_i32 = arith.constant 6 : i32
    %65 = arith.index_cast %c6_i32 : i32 to index
    %c0_34 = arith.constant 0 : index
    %c0_35 = arith.constant 0 : index
    %66 = vector.load %arg2[%65, %c0_34, %c0_35] : memref<8x8x128xf32, #tpu.memory_space<vmem>>, vector<1x8x128xf32>
    %67 = vector.shape_cast %66 : vector<1x8x128xf32> to vector<8x128xf32>
    %cst_36 = arith.constant dense<0.000000e+00> : vector<8x128xf32>
    %68 = tpu.matmul %60, %3, %cst_36 {dimension_numbers = #tpu.dot_dimension_numbers<[1], [0], [0], [1], [0, 0, 1, 1], [], []>} : vector<8x128xf32>, vector<128x128xf32>, vector<8x128xf32> -> vector<8x128xf32>
    %69 = arith.addf %67, %68 : vector<8x128xf32>
    %70 = math.tanh %69 : vector<8x128xf32>
    %71 = arith.index_cast %c6_i32 : i32 to index
    %c0_37 = arith.constant 0 : index
    %c0_38 = arith.constant 0 : index
    %72 = vector.load %arg4[%71, %c0_37, %c0_38] : memref<8x8x128xf32, #tpu.memory_space<vmem>>, vector<1x8x128xf32>
    %73 = vector.shape_cast %72 : vector<1x8x128xf32> to vector<8x128xf32>
    %74 = vector.shape_cast %70 : vector<8x128xf32> to vector<1x8x128xf32>
    tpu.vector_store %arg4[%71, %c0_37, %c0_38], %74 {strides = array<i32>} : memref<8x8x128xf32, #tpu.memory_space<vmem>>, vector<1x8x128xf32>,
    %c7_i32 = arith.constant 7 : i32
    %75 = arith.index_cast %c7_i32 : i32 to index
    %c0_39 = arith.constant 0 : index
    %c0_40 = arith.constant 0 : index
    %76 = vector.load %arg2[%75, %c0_39, %c0_40] : memref<8x8x128xf32, #tpu.memory_space<vmem>>, vector<1x8x128xf32>
    %77 = vector.shape_cast %76 : vector<1x8x128xf32> to vector<8x128xf32>
    %cst_41 = arith.constant dense<0.000000e+00> : vector<8x128xf32>
    %78 = tpu.matmul %70, %3, %cst_41 {dimension_numbers = #tpu.dot_dimension_numbers<[1], [0], [0], [1], [0, 0, 1, 1], [], []>} : vector<8x128xf32>, vector<128x128xf32>, vector<8x128xf32> -> vector<8x128xf32>
    %79 = arith.addf %77, %78 : vector<8x128xf32>
    %80 = math.tanh %79 : vector<8x128xf32>
    %81 = arith.index_cast %c7_i32 : i32 to index
    %c0_42 = arith.constant 0 : index
    %c0_43 = arith.constant 0 : index
    %82 = vector.load %arg4[%81, %c0_42, %c0_43] : memref<8x8x128xf32, #tpu.memory_space<vmem>>, vector<1x8x128xf32>
    %83 = vector.shape_cast %82 : vector<1x8x128xf32> to vector<8x128xf32>
    %84 = vector.shape_cast %80 : vector<8x128xf32> to vector<1x8x128xf32>
    tpu.vector_store %arg4[%81, %c0_42, %c0_43], %84 {strides = array<i32>} : memref<8x8x128xf32, #tpu.memory_space<vmem>>, vector<1x8x128xf32>,
    %c8_i32 = arith.constant 8 : i32
    %c0_44 = arith.constant 0 : index
    %c0_45 = arith.constant 0 : index
    %85 = vector.load %arg5[%c0_44, %c0_45] : memref<8x128xf32, #tpu.memory_space<vmem>>, vector<8x128xf32>
    tpu.vector_store %arg5[%c0_44, %c0_45], %80 {strides = array<i32>} : memref<8x128xf32, #tpu.memory_space<vmem>>, vector<8x128xf32>,
    return
  }
  func.func @transform_0(%arg0: i32, %arg1: i32) -> (i32, i32, i32) {
    %c0_i32 = arith.constant 0 : i32
    %c0_i32_0 = arith.constant 0 : i32
    return %arg1, %arg0, %c0_i32 : i32, i32, i32
  }
  func.func @transform_1(%arg0: i32, %arg1: i32) -> (i32, i32) {
    %c0_i32 = arith.constant 0 : i32
    %c0_i32_0 = arith.constant 0 : i32
    %c0_i32_1 = arith.constant 0 : i32
    return %c0_i32, %c0_i32_0 : i32, i32
  }
  func.func @transform_2(%arg0: i32, %arg1: i32) -> (i32, i32, i32) {
    %c0_i32 = arith.constant 0 : i32
    %c0_i32_0 = arith.constant 0 : i32
    return %arg1, %arg0, %c0_i32 : i32, i32, i32
  }
}

module attributes {stable_mosaic.version = 11 : i64} {
  func.func @_out_proj_kernel(%arg0: i32, %arg1: memref<64x128xf32, #tpu.memory_space<vmem>>, %arg2: memref<128x128xf32, #tpu.memory_space<vmem>>, %arg3: memref<1x128xf32, #tpu.memory_space<vmem>>, %arg4: memref<64x128xf32, #tpu.memory_space<vmem>>) attributes {dimension_semantics = [#tpu.dimension_semantics<parallel>], iteration_bounds = array<i64: 1>, scalar_prefetch = 0 : i64, scratch_operands = 0 : i64, tpu.core_type = #tpu.core_type<tc>, window_params = [{transform_indices = @transform_0, window_bounds = array<i64: 64, 128>}, {pipeline_mode = #tpu.pipeline_mode<synchronous>, transform_indices = @transform_1, window_bounds = array<i64: 128, 128>}, {pipeline_mode = #tpu.pipeline_mode<synchronous>, transform_indices = @transform_2, window_bounds = array<i64: 1, 128>}, {transform_indices = @transform_3, window_bounds = array<i64: 64, 128>}]} {
    %c0 = arith.constant 0 : index
    %c0_0 = arith.constant 0 : index
    %0 = vector.load %arg1[%c0, %c0_0] : memref<64x128xf32, #tpu.memory_space<vmem>>, vector<64x128xf32>
    %c0_1 = arith.constant 0 : index
    %c0_2 = arith.constant 0 : index
    %1 = vector.load %arg2[%c0_1, %c0_2] : memref<128x128xf32, #tpu.memory_space<vmem>>, vector<128x128xf32>
    %cst = arith.constant dense<0.000000e+00> : vector<64x128xf32>
    %2 = tpu.matmul %0, %1, %cst {dimension_numbers = #tpu.dot_dimension_numbers<[1], [0], [0], [1], [0, 0, 1, 1], [], []>} : vector<64x128xf32>, vector<128x128xf32>, vector<64x128xf32> -> vector<64x128xf32>
    %c0_3 = arith.constant 0 : index
    %c0_4 = arith.constant 0 : index
    %3 = vector.load %arg3[%c0_3, %c0_4] : memref<1x128xf32, #tpu.memory_space<vmem>>, vector<1x128xf32>
    %4 = vector.broadcast %3 : vector<1x128xf32> to vector<64x128xf32>
    %5 = arith.addf %2, %4 : vector<64x128xf32>
    %c0_5 = arith.constant 0 : index
    %c0_6 = arith.constant 0 : index
    %6 = vector.load %arg4[%c0_5, %c0_6] : memref<64x128xf32, #tpu.memory_space<vmem>>, vector<64x128xf32>
    tpu.vector_store %arg4[%c0_5, %c0_6], %5 {strides = array<i32>} : memref<64x128xf32, #tpu.memory_space<vmem>>, vector<64x128xf32>,
    return
  }
  func.func @transform_0(%arg0: i32) -> (i32, i32) {
    %c0_i32 = arith.constant 0 : i32
    %c0_i32_0 = arith.constant 0 : i32
    return %arg0, %c0_i32 : i32, i32
  }
  func.func @transform_1(%arg0: i32) -> (i32, i32) {
    %c0_i32 = arith.constant 0 : i32
    %c0_i32_0 = arith.constant 0 : i32
    %c0_i32_1 = arith.constant 0 : i32
    return %c0_i32, %c0_i32_0 : i32, i32
  }
  func.func @transform_2(%arg0: i32) -> (i32, i32) {
    %c0_i32 = arith.constant 0 : i32
    %c0_i32_0 = arith.constant 0 : i32
    %c0_i32_1 = arith.constant 0 : i32
    return %c0_i32, %c0_i32_0 : i32, i32
  }
  func.func @transform_3(%arg0: i32) -> (i32, i32) {
    %c0_i32 = arith.constant 0 : i32
    %c0_i32_0 = arith.constant 0 : i32
    return %arg0, %c0_i32 : i32, i32
  }
}

</mosaic_0001>

<bundles_post_ra>
// kernel: elman_forward.3
= control target key start
LH: loop header
LB: loop body
LE: loop exit
PB: predicated region body
PF: predicated region fallthrough
CT: control target
= control target key end

     0   :  { %s398_s1 = inlined_call_operand.vmem [shape: f32[128,128], index: 1, kind: input, shape index: {}]   ;;  %s399_s0 = inlined_call_operand.vmem [shape: f32[64,128], index: 0, kind: input, shape index: {}]   ;;  %s400_s2 = inlined_call_operand.vmem [shape: f32[1,128], index: 2, kind: input, shape index: {}]   ;;  %s401_s3 = inlined_call_operand.vmem [shape: f32[64,128], index: 3, kind: output, shape index: {}]  }
   0x1   :  { %v22_v0 = vld [vmem:[%s398_s1] sm:$0xff]  ;;  %v23_v1 = vld [vmem:[%s398_s1 + $0x8] sm:$0xff]  ;;  %v24_v2 = vld [vmem:[%s398_s1 + $0x10] sm:$0xff] }
   0x2   :  { %v231_v3 = vpack.c.bf16 %v23_v1, %v22_v0  ;;  %v25_v4 = vld [vmem:[%s398_s1 + $0x18] sm:$0xff]  ;;  %v26_v6 = vld [vmem:[%s398_s1 + $0x20] sm:$0xff]  ;;  %v27_v7 = vld [vmem:[%s398_s1 + $0x28] sm:$0xff] }
   0x3   :  { %v235_v5 = vpack.c.bf16 %v25_v4, %v24_v2  ;;  %v239_v8 = vpack.c.bf16 %v27_v7, %v26_v6  ;;  %v14_v9 = vld [vmem:[%s399_s0] sm:$0xff]  ;;  %v28_v11 = vld [vmem:[%s398_s1 + $0x30] sm:$0xff]  ;;  %v29_v12 = vld [vmem:[%s398_s1 + $0x38] sm:$0xff] }
   0x4   :  { %232 = vmatprep.subr.bf16.mxu0 %v231_v3  ;;  %263 = vmatprep.subr.bf16.mxu1 %v231_v3  ;;  %v18_v10 = vld [vmem:[%s399_s0 + $0x20] sm:$0xff]  ;;  %v243_v13 = vpack.c.bf16 %v29_v12, %v28_v11  ;;  %v31_v15 = vld [vmem:[%s398_s1 + $0x48] sm:$0xff]  ;;  %v32_v17 = vld [vmem:[%s398_s1 + $0x50] sm:$0xff] }
   0x5   :  { %234 = vmatpush3.bf16.msra.mxu0 %v231_v3  ;;  %271 = vmatpush3.bf16.msra.mxu1 %v231_v3  ;;  %v30_v14 = vld [vmem:[%s398_s1 + $0x40] sm:$0xff]  ;;  %v33_v18 = vld [vmem:[%s398_s1 + $0x58] sm:$0xff]  ;;  %v35_v21 = vld [vmem:[%s398_s1 + $0x68] sm:$0xff] }
   0x6   :  { %236 = vmatprep.subr.bf16.mxu0 %v235_v5  ;;  %264 = vmatprep.subr.bf16.mxu1 %v235_v5  ;;  %v247_v16 = vpack.c.bf16 %v31_v15, %v30_v14  ;;  %v251_v19 = vpack.c.bf16 %v33_v18, %v32_v17  ;;  %v34_v20 = vld [vmem:[%s398_s1 + $0x60] sm:$0xff]  ;;  %v36_v23 = vld [vmem:[%s398_s1 + $0x70] sm:$0xff]  ;;  %v37_v24 = vld [vmem:[%s398_s1 + $0x78] sm:$0xff] }
   0x7   :  { %219 = vmatprep.mubr.f32.mxu0 %v14_v9  ;;  %225 = vmatprep.mubr.f32.mxu1 %v18_v10  ;;  %v255_v22 = vpack.c.bf16 %v35_v21, %v34_v20  ;;  %v259_v25 = vpack.c.bf16 %v37_v24, %v36_v23  ;;  %v15_v26 = vld [vmem:[%s399_s0 + $0x8] sm:$0xff]  ;;  %v16_v28 = vld [vmem:[%s399_s0 + $0x10] sm:$0xff]  ;;  %v17_v30 = vld [vmem:[%s399_s0 + $0x18] sm:$0xff] }
   0x8   :  { %v19_v27 = vld [vmem:[%s399_s0 + $0x28] sm:$0xff]  ;;  %v20_v29 = vld [vmem:[%s399_s0 + $0x30] sm:$0xff]  ;;  %v21_v31 = vld [vmem:[%s399_s0 + $0x38] sm:$0xff] }
   0x9   :  { %238 = vmatpush3.bf16.msra.mxu0 %v235_v5  ;;  %272 = vmatpush3.bf16.msra.mxu1 %v235_v5  ;;  %v162_v32 = vld [vmem:[%s400_s2] ss:$0 sm:$0xff] }
   0xa   :  { %240 = vmatprep.subr.bf16.mxu0 %v239_v8  ;;  %265 = vmatprep.subr.bf16.mxu1 %v239_v8 }
   0xd   :  { %242 = vmatpush3.bf16.msra.mxu0 %v239_v8  ;;  %273 = vmatpush3.bf16.msra.mxu1 %v239_v8 }
   0xe   :  { %244 = vmatprep.subr.bf16.mxu0 %v243_v13  ;;  %266 = vmatprep.subr.bf16.mxu1 %v243_v13 }
  0x11   :  { %246 = vmatpush3.bf16.msra.mxu0 %v243_v13  ;;  %274 = vmatpush3.bf16.msra.mxu1 %v243_v13 }
  0x12   :  { %248 = vmatprep.subr.bf16.mxu0 %v247_v16  ;;  %267 = vmatprep.subr.bf16.mxu1 %v247_v16 }
  0x15   :  { %250 = vmatpush3.bf16.msra.mxu0 %v247_v16  ;;  %275 = vmatpush3.bf16.msra.mxu1 %v247_v16 }
  0x16   :  { %252 = vmatprep.subr.bf16.mxu0 %v251_v19  ;;  %268 = vmatprep.subr.bf16.mxu1 %v251_v19 }
  0x19   :  { %254 = vmatpush3.bf16.msra.mxu0 %v251_v19  ;;  %276 = vmatpush3.bf16.msra.mxu1 %v251_v19 }
  0x1a   :  { %256 = vmatprep.subr.bf16.mxu0 %v255_v22  ;;  %269 = vmatprep.subr.bf16.mxu1 %v255_v22 }
  0x1d   :  { %258 = vmatpush3.bf16.msra.mxu0 %v255_v22  ;;  %277 = vmatpush3.bf16.msra.mxu1 %v255_v22 }
  0x1e   :  { %260 = vmatprep.subr.bf16.mxu0 %v259_v25  ;;  %270 = vmatprep.subr.bf16.mxu1 %v259_v25 }
  0x21   :  { %262 = vmatpush3.bf16.msra.mxu0 %v259_v25  ;;  %278 = vmatpush3.bf16.msra.mxu1 %v259_v25 }
  0x24   :  { %220 = vmatmul.mubr.f32.vlgmr.msra.gmra.mrb[0].mxu0 %v15_v26  ;;  %226 = vmatmul.mubr.f32.vlgmr.msra.gmra.mrb[0].mxu1 %v19_v27 }
  0x25   :  { %222 = vmatprep.mubr.f32.mxu0 %v16_v28  ;;  %228 = vmatprep.mubr.f32.mxu1 %v20_v29 }
  0x28   :  { %223 = vmatmul.mubr.f32.gmra.mrb[2].mxu0 %v17_v30  ;;  %229 = vmatmul.mubr.f32.gmra.mrb[2].mxu1 %v21_v31 }
  0xf7   :  { %v221_v33 = vpop.f32.mrb[0].mxu0  ;;  %v227_v34 = vpop.f32.mrb[0].mxu1 }
  0xf8   :  { %v117_v35 = vadd.f32 %v221_v33, %v162_v32  ;;  %v137_v36 = vadd.f32 %v227_v34, %v162_v32  ;;  %v111_v37 = vpop.f32.mrb[1].mxu0  ;;  %v131_v38 = vpop.f32.mrb[1].mxu1 }
  0xf9   :  { %v112_v39 = vadd.f32 %v162_v32, %v111_v37  ;;  %v132_v40 = vadd.f32 %v162_v32, %v131_v38 }
  0xfa   :  { %151 = vst [vmem:[%s401_s3 + $0x8] sm:$0xff] %v117_v35  ;;  %155 = vst [vmem:[%s401_s3 + $0x28] sm:$0xff] %v137_v36 }
  0xfb   :  { %150 = vst [vmem:[%s401_s3] sm:$0xff] %v112_v39  ;;  %154 = vst [vmem:[%s401_s3 + $0x20] sm:$0xff] %v132_v40  ;;  %v224_v41 = vpop.f32.mrb[2].mxu0  ;;  %v230_v42 = vpop.f32.mrb[2].mxu1 }
  0xfc   :  { %v127_v43 = vadd.f32 %v224_v41, %v162_v32  ;;  %v147_v44 = vadd.f32 %v230_v42, %v162_v32  ;;  %v121_v45 = vpop.f32.mrb[3].mxu0  ;;  %v141_v46 = vpop.f32.mrb[3].mxu1 }
  0xfd   :  { %v122_v47 = vadd.f32 %v162_v32, %v121_v45  ;;  %v142_v48 = vadd.f32 %v162_v32, %v141_v46 }
  0xfe   :  { %153 = vst [vmem:[%s401_s3 + $0x18] sm:$0xff] %v127_v43  ;;  %157 = vst [vmem:[%s401_s3 + $0x38] sm:$0xff] %v147_v44 }
  0xff   :  { %152 = vst [vmem:[%s401_s3 + $0x10] sm:$0xff] %v122_v47  ;;  %156 = vst [vmem:[%s401_s3 + $0x30] sm:$0xff] %v142_v48 }

// kernel: elman_forward.2
= control target key start
LH: loop header
LB: loop body
LE: loop exit
PB: predicated region body
PF: predicated region fallthrough
CT: control target
= control target key end

     0   :  { %v1285_v0 = vmov 0.0|0.0   ;;  %vm1286_vm0 = vmmov 0   ;;  %v1287_v4 = vmov 0.0   ;;  %s1560_s1 = inlined_call_operand.vmem [shape: f32[128,128], index: 1, kind: input, shape index: {}]   ;;  %s1561_s0 = inlined_call_operand.vmem [shape: f32[8,8,128], index: 0, kind: input, shape index: {}]   ;;  %s1562_s2 = inlined_call_operand.vmem [shape: f32[8,8,128], index: 2, kind: output, shape index: {}]  }
   0x1   :  { %1074 = vmatprep.subr.bf16.mxu0 %v1285_v0  ;;  %v16_v1 = vld [vmem:[%s1560_s1] sm:$0xff]  ;;  %v17_v2 = vld [vmem:[%s1560_s1 + $0x8] sm:$0xff]  ;;  %v18_v3 = vld [vmem:[%s1560_s1 + $0x10] sm:$0xff]  ;;  %826 = vmatprep.mubr.msk.f32.mxu0 %vm1286_vm0, %v1287_v4 }
   0x2   :  { %v1315_v5 = vpack.c.bf16 %v17_v2, %v16_v1  ;;  %v19_v6 = vld [vmem:[%s1560_s1 + $0x18] sm:$0xff]  ;;  %1098 = vmatprep.subr.bf16.mxu1 %v1285_v0  ;;  %861 = vmatprep.mubr.msk.f32.mxu1 %vm1286_vm0, %v1287_v4  ;;  %v20_v8 = vld [vmem:[%s1560_s1 + $0x20] sm:$0xff]  ;;  %v21_v9 = vld [vmem:[%s1560_s1 + $0x28] sm:$0xff] }
   0x3   :  { %v1324_v7 = vpack.c.bf16 %v19_v6, %v18_v3  ;;  %v1336_v10 = vpack.c.bf16 %v21_v9, %v20_v8  ;;  %v22_v11 = vld [vmem:[%s1560_s1 + $0x30] sm:$0xff]  ;;  %v23_v12 = vld [vmem:[%s1560_s1 + $0x38] sm:$0xff]  ;;  %v24_v14 = vld [vmem:[%s1560_s1 + $0x40] sm:$0xff] }
   0x4   :  { %1076 = vmatpush3.bf16.msra.mxu0 %v1315_v5  ;;  %1100 = vmatpush3.bf16.msra.mxu1 %v1315_v5  ;;  %v1348_v13 = vpack.c.bf16 %v23_v12, %v22_v11  ;;  %v25_v15 = vld [vmem:[%s1560_s1 + $0x48] sm:$0xff]  ;;  %v26_v17 = vld [vmem:[%s1560_s1 + $0x50] sm:$0xff]  ;;  %v27_v18 = vld [vmem:[%s1560_s1 + $0x58] sm:$0xff] }
   0x5   :  { %1077 = vmatprep.subr.bf16.mxu0 %v1285_v0  ;;  %1101 = vmatprep.subr.bf16.mxu1 %v1285_v0  ;;  %v1360_v16 = vpack.c.bf16 %v25_v15, %v24_v14  ;;  %v1372_v19 = vpack.c.bf16 %v27_v18, %v26_v17  ;;  %v28_v20 = vld [vmem:[%s1560_s1 + $0x60] sm:$0xff]  ;;  %v29_v21 = vld [vmem:[%s1560_s1 + $0x68] sm:$0xff]  ;;  %v30_v23 = vld [vmem:[%s1560_s1 + $0x70] sm:$0xff] }
   0x6   :  { %v1384_v22 = vpack.c.bf16 %v29_v21, %v28_v20  ;;  %v31_v24 = vld [vmem:[%s1560_s1 + $0x78] sm:$0xff]  ;;  %v33_v26 = vld [vmem:[%s1561_s0] sm:$0xff]  ;;  %v644_v31 = vld [vmem:[%s1561_s0 + $0x8] sm:$0xff] }
   0x7   :  { %v1396_v25 = vpack.c.bf16 %v31_v24, %v30_v23  ;;  %v646_v36 = vld [vmem:[%s1561_s0 + $0x10] sm:$0xff]  ;;  %v648_v41 = vld [vmem:[%s1561_s0 + $0x18] sm:$0xff]  ;;  %v650_v46 = vld [vmem:[%s1561_s0 + $0x20] sm:$0xff] }
   0x8   :  { %1079 = vmatpush3.bf16.msra.mxu0 %v1324_v7  ;;  %1103 = vmatpush3.bf16.msra.mxu1 %v1324_v7  ;;  %v652_v51 = vld [vmem:[%s1561_s0 + $0x28] sm:$0xff]  ;;  %v654_v56 = vld [vmem:[%s1561_s0 + $0x30] sm:$0xff]  ;;  %v656_v61 = vld [vmem:[%s1561_s0 + $0x38] sm:$0xff] }
   0x9   :  { %1080 = vmatprep.subr.bf16.mxu0 %v1285_v0  ;;  %1104 = vmatprep.subr.bf16.mxu1 %v1285_v0 }
   0xc   :  { %1082 = vmatpush3.bf16.msra.mxu0 %v1336_v10  ;;  %1106 = vmatpush3.bf16.msra.mxu1 %v1336_v10 }
   0xd   :  { %1083 = vmatprep.subr.bf16.mxu0 %v1285_v0  ;;  %1107 = vmatprep.subr.bf16.mxu1 %v1285_v0 }
  0x10   :  { %1085 = vmatpush3.bf16.msra.mxu0 %v1348_v13  ;;  %1109 = vmatpush3.bf16.msra.mxu1 %v1348_v13 }
  0x11   :  { %1086 = vmatprep.subr.bf16.mxu0 %v1285_v0  ;;  %1110 = vmatprep.subr.bf16.mxu1 %v1285_v0 }
  0x14   :  { %1088 = vmatpush3.bf16.msra.mxu0 %v1360_v16  ;;  %1112 = vmatpush3.bf16.msra.mxu1 %v1360_v16 }
  0x15   :  { %1089 = vmatprep.subr.bf16.mxu0 %v1285_v0  ;;  %1113 = vmatprep.subr.bf16.mxu1 %v1285_v0 }
  0x18   :  { %1091 = vmatpush3.bf16.msra.mxu0 %v1372_v19  ;;  %1115 = vmatpush3.bf16.msra.mxu1 %v1372_v19 }
  0x19   :  { %1092 = vmatprep.subr.bf16.mxu0 %v1285_v0  ;;  %1116 = vmatprep.subr.bf16.mxu1 %v1285_v0 }
  0x1c   :  { %1094 = vmatpush3.bf16.msra.mxu0 %v1384_v22  ;;  %1118 = vmatpush3.bf16.msra.mxu1 %v1384_v22 }
  0x1d   :  { %1095 = vmatprep.subr.bf16.mxu0 %v1285_v0  ;;  %1119 = vmatprep.subr.bf16.mxu1 %v1285_v0 }
  0x20   :  { %1097 = vmatpush3.bf16.msra.mxu0 %v1396_v25  ;;  %1121 = vmatpush3.bf16.msra.mxu1 %v1396_v25 }
  0x21   :  { %1122 = vmatprep.subr.bf16.mxu0 %v1285_v0  ;;  %1146 = vmatprep.subr.bf16.mxu1 %v1285_v0 }
  0x23   :  { %827 = vmatmul.mubr.f32.vlgmr.msra.gmra.mrb[0].mxu0 %v1287_v4 }
  0x24   :  { %1124 = vmatpush3.bf16.msra.mxu0 %v1315_v5  ;;  %896 = vmatprep.mubr.msk.f32.mxu0 %vm1286_vm0, %v1287_v4 }
  0x25   :  { %1125 = vmatprep.subr.bf16.mxu0 %v1285_v0 }
  0x28   :  { %1127 = vmatpush3.bf16.msra.mxu0 %v1324_v7 }
  0x29   :  { %1128 = vmatprep.subr.bf16.mxu0 %v1285_v0 }
  0x2c   :  { %1130 = vmatpush3.bf16.msra.mxu0 %v1336_v10 }
  0x2d   :  { %1131 = vmatprep.subr.bf16.mxu0 %v1285_v0 }
  0x30   :  { %1133 = vmatpush3.bf16.msra.mxu0 %v1348_v13 }
  0x31   :  { %1134 = vmatprep.subr.bf16.mxu0 %v1285_v0 }
  0x34   :  { %1136 = vmatpush3.bf16.msra.mxu0 %v1360_v16 }
  0x35   :  { %1137 = vmatprep.subr.bf16.mxu0 %v1285_v0 }
  0x38   :  { %1139 = vmatpush3.bf16.msra.mxu0 %v1372_v19 }
  0x39   :  { %1140 = vmatprep.subr.bf16.mxu0 %v1285_v0 }
  0x3c   :  { %1142 = vmatpush3.bf16.msra.mxu0 %v1384_v22 }
  0x3d   :  { %1143 = vmatprep.subr.bf16.mxu0 %v1285_v0 }
  0x40   :  { %1145 = vmatpush3.bf16.msra.mxu0 %v1396_v25 }
  0x41   :  { %1170 = vmatprep.subr.bf16.mxu0 %v1285_v0 }
  0xf6   :  { %v100_v27 = vpop.f32.mrb[0].mxu0 }
  0xf7   :  { %v104_v28 = vadd.f32 %v100_v27, %v33_v26  ;;  %v828_v29 = vpop.f32.mrb[1].mxu0 }
  0xf9   :  { %1269 = vtanh.f32 %v104_v28 }
 0x103   :  { %v1270_v30 = vpop.eup %1269 }
 0x104   :  { %106 = vst [vmem:[%s1562_s2] sm:$0xff] %v1270_v30  ;;  %862 = vmatmul.mubr.f32.vlgmr.msra.gmra.mrb[0].mxu1 %v1270_v30 }
 0x105   :  { %1148 = vmatpush3.bf16.msra.mxu1 %v1315_v5  ;;  %931 = vmatprep.mubr.msk.f32.mxu1 %vm1286_vm0, %v1287_v4 }
 0x106   :  { %1149 = vmatprep.subr.bf16.mxu1 %v1285_v0 }
 0x109   :  { %1151 = vmatpush3.bf16.msra.mxu1 %v1324_v7 }
 0x10a   :  { %1152 = vmatprep.subr.bf16.mxu1 %v1285_v0 }
 0x10d   :  { %1154 = vmatpush3.bf16.msra.mxu1 %v1336_v10 }
 0x10e   :  { %1155 = vmatprep.subr.bf16.mxu1 %v1285_v0 }
 0x111   :  { %1157 = vmatpush3.bf16.msra.mxu1 %v1348_v13 }
 0x112   :  { %1158 = vmatprep.subr.bf16.mxu1 %v1285_v0 }
 0x115   :  { %1160 = vmatpush3.bf16.msra.mxu1 %v1360_v16 }
 0x116   :  { %1161 = vmatprep.subr.bf16.mxu1 %v1285_v0 }
 0x119   :  { %1163 = vmatpush3.bf16.msra.mxu1 %v1372_v19 }
 0x11a   :  { %1164 = vmatprep.subr.bf16.mxu1 %v1285_v0 }
 0x11d   :  { %1166 = vmatpush3.bf16.msra.mxu1 %v1384_v22 }
 0x11e   :  { %1167 = vmatprep.subr.bf16.mxu1 %v1285_v0 }
 0x121   :  { %1169 = vmatpush3.bf16.msra.mxu1 %v1396_v25 }
 0x122   :  { %1194 = vmatprep.subr.bf16.mxu1 %v1285_v0 }
 0x1d7   :  { %v175_v32 = vpop.f32.mrb[0].mxu1 }
 0x1d8   :  { %v179_v33 = vadd.f32 %v644_v31, %v175_v32  ;;  %v863_v34 = vpop.f32.mrb[1].mxu1 }
 0x1da   :  { %1271 = vtanh.f32 %v179_v33 }
 0x1e4   :  { %v1272_v35 = vpop.eup %1271 }
 0x1e5   :  { %645 = vst [vmem:[%s1562_s2 + $0x8] sm:$0xff] %v1272_v35  ;;  %897 = vmatmul.mubr.f32.vlgmr.msra.gmra.mrb[2].mxu0 %v1272_v35 }
 0x1e6   :  { %1172 = vmatpush3.bf16.msra.mxu0 %v1315_v5  ;;  %966 = vmatprep.mubr.msk.f32.mxu0 %vm1286_vm0, %v1287_v4 }
 0x1e7   :  { %1173 = vmatprep.subr.bf16.mxu0 %v1285_v0 }
 0x1ea   :  { %1175 = vmatpush3.bf16.msra.mxu0 %v1324_v7 }
 0x1eb   :  { %1176 = vmatprep.subr.bf16.mxu0 %v1285_v0 }
 0x1ee   :  { %1178 = vmatpush3.bf16.msra.mxu0 %v1336_v10 }
 0x1ef   :  { %1179 = vmatprep.subr.bf16.mxu0 %v1285_v0 }
 0x1f2   :  { %1181 = vmatpush3.bf16.msra.mxu0 %v1348_v13 }
 0x1f3   :  { %1182 = vmatprep.subr.bf16.mxu0 %v1285_v0 }
 0x1f6   :  { %1184 = vmatpush3.bf16.msra.mxu0 %v1360_v16 }
 0x1f7   :  { %1185 = vmatprep.subr.bf16.mxu0 %v1285_v0 }
 0x1fa   :  { %1187 = vmatpush3.bf16.msra.mxu0 %v1372_v19 }
 0x1fb   :  { %1188 = vmatprep.subr.bf16.mxu0 %v1285_v0 }
 0x1fe   :  { %1190 = vmatpush3.bf16.msra.mxu0 %v1384_v22 }
 0x1ff   :  { %1191 = vmatprep.subr.bf16.mxu0 %v1285_v0 }
 0x202   :  { %1193 = vmatpush3.bf16.msra.mxu0 %v1396_v25 }
 0x203   :  { %1218 = vmatprep.subr.bf16.mxu0 %v1285_v0 }
 0x2b8   :  { %v251_v37 = vpop.f32.mrb[2].mxu0 }
 0x2b9   :  { %v255_v38 = vadd.f32 %v646_v36, %v251_v37  ;;  %v898_v39 = vpop.f32.mrb[3].mxu0 }
 0x2bb   :  { %1273 = vtanh.f32 %v255_v38 }
 0x2c5   :  { %v1274_v40 = vpop.eup %1273 }
 0x2c6   :  { %647 = vst [vmem:[%s1562_s2 + $0x10] sm:$0xff] %v1274_v40  ;;  %932 = vmatmul.mubr.f32.vlgmr.msra.gmra.mrb[2].mxu1 %v1274_v40 }
 0x2c7   :  { %1196 = vmatpush3.bf16.msra.mxu1 %v1315_v5  ;;  %1001 = vmatprep.mubr.msk.f32.mxu1 %vm1286_vm0, %v1287_v4 }
 0x2c8   :  { %1197 = vmatprep.subr.bf16.mxu1 %v1285_v0 }
 0x2cb   :  { %1199 = vmatpush3.bf16.msra.mxu1 %v1324_v7 }
 0x2cc   :  { %1200 = vmatprep.subr.bf16.mxu1 %v1285_v0 }
 0x2cf   :  { %1202 = vmatpush3.bf16.msra.mxu1 %v1336_v10 }
 0x2d0   :  { %1203 = vmatprep.subr.bf16.mxu1 %v1285_v0 }
 0x2d3   :  { %1205 = vmatpush3.bf16.msra.mxu1 %v1348_v13 }
 0x2d4   :  { %1206 = vmatprep.subr.bf16.mxu1 %v1285_v0 }
 0x2d7   :  { %1208 = vmatpush3.bf16.msra.mxu1 %v1360_v16 }
 0x2d8   :  { %1209 = vmatprep.subr.bf16.mxu1 %v1285_v0 }
 0x2db   :  { %1211 = vmatpush3.bf16.msra.mxu1 %v1372_v19 }
 0x2dc   :  { %1212 = vmatprep.subr.bf16.mxu1 %v1285_v0 }
 0x2df   :  { %1214 = vmatpush3.bf16.msra.mxu1 %v1384_v22 }
 0x2e0   :  { %1215 = vmatprep.subr.bf16.mxu1 %v1285_v0 }
 0x2e3   :  { %1217 = vmatpush3.bf16.msra.mxu1 %v1396_v25 }
 0x2e4   :  { %1242 = vmatprep.subr.bf16.mxu1 %v1285_v0 }
 0x399   :  { %v327_v42 = vpop.f32.mrb[2].mxu1 }
 0x39a   :  { %v331_v43 = vadd.f32 %v648_v41, %v327_v42  ;;  %v933_v44 = vpop.f32.mrb[3].mxu1 }
 0x39c   :  { %1275 = vtanh.f32 %v331_v43 }
 0x3a6   :  { %v1276_v45 = vpop.eup %1275 }
 0x3a7   :  { %649 = vst [vmem:[%s1562_s2 + $0x18] sm:$0xff] %v1276_v45  ;;  %967 = vmatmul.mubr.f32.vlgmr.msra.gmra.mrb[4].mxu0 %v1276_v45 }
 0x3a8   :  { %1220 = vmatpush3.bf16.msra.mxu0 %v1315_v5  ;;  %1036 = vmatprep.mubr.msk.f32.mxu0 %vm1286_vm0, %v1287_v4 }
 0x3a9   :  { %1221 = vmatprep.subr.bf16.mxu0 %v1285_v0 }
 0x3ac   :  { %1223 = vmatpush3.bf16.msra.mxu0 %v1324_v7 }
 0x3ad   :  { %1224 = vmatprep.subr.bf16.mxu0 %v1285_v0 }
 0x3b0   :  { %1226 = vmatpush3.bf16.msra.mxu0 %v1336_v10 }
 0x3b1   :  { %1227 = vmatprep.subr.bf16.mxu0 %v1285_v0 }
 0x3b4   :  { %1229 = vmatpush3.bf16.msra.mxu0 %v1348_v13 }
 0x3b5   :  { %1230 = vmatprep.subr.bf16.mxu0 %v1285_v0 }
 0x3b8   :  { %1232 = vmatpush3.bf16.msra.mxu0 %v1360_v16 }
 0x3b9   :  { %1233 = vmatprep.subr.bf16.mxu0 %v1285_v0 }
 0x3bc   :  { %1235 = vmatpush3.bf16.msra.mxu0 %v1372_v19 }
 0x3bd   :  { %1236 = vmatprep.subr.bf16.mxu0 %v1285_v0 }
 0x3c0   :  { %1238 = vmatpush3.bf16.msra.mxu0 %v1384_v22 }
 0x3c1   :  { %1239 = vmatprep.subr.bf16.mxu0 %v1285_v0 }
 0x3c4   :  { %1241 = vmatpush3.bf16.msra.mxu0 %v1396_v25 }
 0x47a   :  { %v403_v47 = vpop.f32.mrb[4].mxu0 }
 0x47b   :  { %v407_v48 = vadd.f32 %v650_v46, %v403_v47  ;;  %v968_v49 = vpop.f32.mrb[5].mxu0 }
 0x47d   :  { %1277 = vtanh.f32 %v407_v48 }
 0x487   :  { %v1278_v50 = vpop.eup %1277 }
 0x488   :  { %651 = vst [vmem:[%s1562_s2 + $0x20] sm:$0xff] %v1278_v50  ;;  %1002 = vmatmul.mubr.f32.vlgmr.msra.gmra.mrb[4].mxu1 %v1278_v50 }
 0x489   :  { %1244 = vmatpush3.bf16.msra.mxu1 %v1315_v5  ;;  %1071 = vmatprep.mubr.msk.f32.mxu1 %vm1286_vm0, %v1287_v4 }
 0x48a   :  { %1245 = vmatprep.subr.bf16.mxu1 %v1285_v0 }
 0x48d   :  { %1247 = vmatpush3.bf16.msra.mxu1 %v1324_v7 }
 0x48e   :  { %1248 = vmatprep.subr.bf16.mxu1 %v1285_v0 }
 0x491   :  { %1250 = vmatpush3.bf16.msra.mxu1 %v1336_v10 }
 0x492   :  { %1251 = vmatprep.subr.bf16.mxu1 %v1285_v0 }
 0x495   :  { %1253 = vmatpush3.bf16.msra.mxu1 %v1348_v13 }
 0x496   :  { %1254 = vmatprep.subr.bf16.mxu1 %v1285_v0 }
 0x499   :  { %1256 = vmatpush3.bf16.msra.mxu1 %v1360_v16 }
 0x49a   :  { %1257 = vmatprep.subr.bf16.mxu1 %v1285_v0 }
 0x49d   :  { %1259 = vmatpush3.bf16.msra.mxu1 %v1372_v19 }
 0x49e   :  { %1260 = vmatprep.subr.bf16.mxu1 %v1285_v0 }
 0x4a1   :  { %1262 = vmatpush3.bf16.msra.mxu1 %v1384_v22 }
 0x4a2   :  { %1263 = vmatprep.subr.bf16.mxu1 %v1285_v0 }
 0x4a5   :  { %1265 = vmatpush3.bf16.msra.mxu1 %v1396_v25 }
 0x55b   :  { %v479_v52 = vpop.f32.mrb[4].mxu1 }
 0x55c   :  { %v483_v53 = vadd.f32 %v652_v51, %v479_v52  ;;  %v1003_v54 = vpop.f32.mrb[5].mxu1 }
 0x55e   :  { %1279 = vtanh.f32 %v483_v53 }
 0x568   :  { %v1280_v55 = vpop.eup %1279 }
 0x569   :  { %653 = vst [vmem:[%s1562_s2 + $0x28] sm:$0xff] %v1280_v55  ;;  %1037 = vmatmul.mubr.f32.vlgmr.msra.gmra.mrb[6].mxu0 %v1280_v55 }
 0x63c   :  { %v555_v57 = vpop.f32.mrb[6].mxu0 }
 0x63d   :  { %v559_v58 = vadd.f32 %v654_v56, %v555_v57  ;;  %v1038_v59 = vpop.f32.mrb[7].mxu0 }
 0x63f   :  { %1281 = vtanh.f32 %v559_v58 }
 0x649   :  { %v1282_v60 = vpop.eup %1281 }
 0x64a   :  { %655 = vst [vmem:[%s1562_s2 + $0x30] sm:$0xff] %v1282_v60  ;;  %1072 = vmatmul.mubr.f32.vlgmr.msra.gmra.mrb[6].mxu1 %v1282_v60 }
 0x71d   :  { %v631_v62 = vpop.f32.mrb[6].mxu1 }
 0x71e   :  { %v635_v63 = vadd.f32 %v656_v61, %v631_v62  ;;  %v1073_v0 = vpop.f32.mrb[7].mxu1 }
 0x720   :  { %1283 = vtanh.f32 %v635_v63 }
 0x72a   :  { %v1284_v1 = vpop.eup %1283 }
 0x72b   :  { %657 = vst [vmem:[%s1562_s2 + $0x38] sm:$0xff] %v1284_v1 }

</bundles_post_ra>
